<compile_context>
chip_gen: v7x
topology: tpu7x:2x2x1
jax: 0.10.0
libtpu: 0.0.40
codegen_flags: <defaults>
</compile_context>

<pallas_src>
import functools

import jax
import jax.numpy as jnp
from jax.experimental import pallas as pl
from jax.experimental.pallas import tpu as pltpu


# --------------------------------------------------------------------------- #
# Kernel
# --------------------------------------------------------------------------- #
def _additive_attn_kernel(key_ref, query_ref, wk_ref, wq_ref, bias_ref, v_ref,
                          out_ref, *, elem_dtype):
    # key_ref:   (Bt, M, KD, S_t)  activation dtype, S_t on lanes
    # query_ref: (Bt, QD, S_t)     activation dtype
    # wk_ref:    (H, KD)           wq_ref: (H, QD)
    # bias_ref:  (H, 1) f32        (bk + bq folded once)
    # v_ref:     (H, 1) f32
    # out_ref:   (Bt, M, S_t) f32
    Bt, M, KD, S_t = key_ref.shape
    H, QD = wq_ref.shape
    G = Bt * M

    # Key projection: per-(b, m) matmul (H, KD) @ (KD, S_t) -> (H, S_t); the
    # MXU output minor dim is the lane-dense S_t.  f32 accumulation.
    key_g = key_ref[...].reshape(G, KD, S_t)                    # merge leading dims
    wk_b = jnp.broadcast_to(wk_ref[...], (G, H, KD))            # tiny, shared weights
    kp = jnp.einsum('ghk,gks->ghs', wk_b, key_g,
                    preferred_element_type=jnp.float32)         # (G, H, S_t) f32

    # Query projection (no modality axis -> M times smaller); fold both linear
    # biases here so the big kp tensor never sees a bias pass.
    wq_b = jnp.broadcast_to(wq_ref[...], (Bt, H, QD))
    qp = jnp.einsum('bhq,bqs->bhs', wq_b, query_ref[...],
                    preferred_element_type=jnp.float32)         # (Bt, H, S_t) f32
    qp = qp + bias_ref[...]                                     # (H,1) broadcast over lanes

    # The add/tanh/mul phase is the dominant cost (one tanh per key element).
    # elem_dtype is bf16 on v6e/v7x (bf16 EUP/VPU), f32 on v5e/unknown.
    kp4 = kp.reshape(Bt, M, H, S_t).astype(elem_dtype)
    qp4 = qp.reshape(Bt, 1, H, S_t).astype(elem_dtype)
    energy = jnp.tanh(kp4 + qp4)                                # (Bt, M, H, S_t)

    # v-weighted reduction over H (sublane axis); v is f32 so the product and
    # the accumulation stay f32.
    score = jnp.sum(energy * v_ref[...], axis=2)                # (Bt, M, S_t) f32

    # Numerically stable softmax over the modality axis (torch dim=1); M is a
    # leading axis so the reductions are cheap cross-vreg ops.
    m = jnp.max(score, axis=1, keepdims=True)
    e = jnp.exp(score - m)
    denom = jnp.sum(e, axis=1, keepdims=True)
    out_ref[...] = e * pl.reciprocal(denom, approx=True)


# --------------------------------------------------------------------------- #
# Tiling
# --------------------------------------------------------------------------- #
def _round_up(x, m):
    return ((x + m - 1) // m) * m


def _step_vmem_bytes(Bt, S_t, M, KD, QD, H, act_bytes, elem_bytes):
    """Conservative, padding-aware (128 lanes / sublane granule) per-step VMEM."""
    lanes = _round_up(S_t, 128)
    sub_act = 16 if act_bytes == 2 else 8
    h_f32 = _round_up(H, 8)
    h_elem = _round_up(H, 16 if elem_bytes == 2 else 8)
    # Double-buffered pipeline buffers.
    key_b = 2 * Bt * M * _round_up(KD, sub_act) * lanes * act_bytes
    qry_b = 2 * Bt * _round_up(QD, sub_act) * lanes * act_bytes
    out_b = 2 * Bt * _round_up(M, 8) * lanes * 4
    wgt_b = 2 * 2 * _round_up(H, sub_act) * 128 * act_bytes \
        + 2 * 2 * h_f32 * 128 * 4
    # In-kernel temporaries: kp (f32) + energy (elem) + v*energy (f32),
    # broadcast weights, qp (f32), softmax temporaries.
    tmp_b = Bt * M * lanes * (h_f32 * 4 + h_elem * elem_bytes + h_f32 * 4)
    tmp_b += Bt * M * _round_up(H, sub_act) * 128 * act_bytes
    tmp_b += Bt * h_f32 * lanes * 4
    tmp_b += 4 * Bt * _round_up(M, 8) * lanes * 4
    return key_b + qry_b + out_b + wgt_b + tmp_b


def _choose_tiles(B, M, S, KD, QD, H, act_bytes, elem_bytes, budget):
    def vmem(bt, st):
        return _step_vmem_bytes(bt, st, M, KD, QD, H, act_bytes, elem_bytes)

    # S tile: largest lane-dense candidate dividing S (else full S) within budget.
    s_cands = sorted({c for c in (2048, 1024, 512, 256, 128) if S % c == 0} | {S},
                     reverse=True)
    S_t = s_cands[-1]
    for cand in s_cands:
        if vmem(1, cand) <= budget:
            S_t = cand
            break

    # Batch blocking: grow while it fits the budget; stop once per-step key
    # traffic (>= ~2 MiB) comfortably amortizes the ~0.35us grid-step overhead.
    key_target = 2 * 1024 * 1024
    Bt = 1
    for cand in range(1, B + 1):
        if B % cand:
            continue
        if vmem(cand, S_t) > budget:
            break
        Bt = cand
        if cand * M * S_t * KD * act_bytes >= key_target:
            break

    # Keep >= 2 grid steps along a parallel axis whenever the problem splits
    # (v7x megacore needs 2 cores busy; pipelining needs >1 step everywhere).
    if (B // Bt) * (S // S_t) < 2:
        if Bt > 1:
            Bt = max(d for d in range(1, B) if B % d == 0)
        elif S_t % 256 == 0:
            S_t //= 2
    return Bt, S_t


def _device_config():
    """(vmem budget for tiling, vmem_limit_bytes, elementwise dtype)."""
    kind = ""
    try:
        kind = jax.devices()[0].device_kind.lower()
    except Exception:  # pragma: no cover - defensive only
        pass
    if "v7" in kind:
        # 64 MiB physical VMEM, 2 TensorCores, bf16 EUP/VPU.
        return 24 << 20, 48 << 20, jnp.bfloat16
    if "v6" in kind:
        # 128 MiB VMEM, bf16 EUP/VPU: big tiles + bf16 elementwise.
        return 48 << 20, 96 << 20, jnp.bfloat16
    if "v5" in kind or "v4" in kind:
        # 128 MiB VMEM but no bf16 VPU/EUP: big tiles, f32 elementwise.
        return 48 << 20, 96 << 20, jnp.float32
    # Unknown device: conservative defaults.
    return 20 << 20, None, jnp.float32


# --------------------------------------------------------------------------- #
# Wrapper
# --------------------------------------------------------------------------- #
def additive_attention(key, query, wk, bk, wq, bq, v, *, input_dtype=jnp.bfloat16):
    """AdditiveAttention forward.

    key: (B, M, S, KD); query: (B, S, QD); wk: (H, KD); wq: (H, QD);
    bk, bq, v: (H,).  Returns (S, B, M) softmax-over-M weights, matching torch.

    input_dtype: dtype the activations/weights enter the kernel in.  bf16 (the
    default) halves the HBM traffic of the dominant key tensor but deviates
    slightly from the f32 PyTorch reference; pass jnp.float32 for strict parity.
    """
    B, M, S, KD = key.shape
    QD = query.shape[-1]
    H = v.shape[0]

    budget, vmem_limit, elem_dtype = _device_config()
    act_bytes = jnp.dtype(input_dtype).itemsize
    elem_bytes = jnp.dtype(elem_dtype).itemsize
    Bt, S_t = _choose_tiles(B, M, S, KD, QD, H, act_bytes, elem_bytes, budget)
    assert B % Bt == 0 and S % S_t == 0

    # Present the activations with S on the minor (lane) axis.  XLA fuses the
    # transpose into the dtype cast (one pass over key), so this is free
    # relative to the cast alone and makes every in-kernel vreg lane-dense.
    key_t = jnp.transpose(key, (0, 1, 3, 2)).astype(input_dtype)     # (B, M, KD, S)
    query_t = jnp.transpose(query, (0, 2, 1)).astype(input_dtype)    # (B, QD, S)
    wk_p = jnp.asarray(wk, input_dtype)                              # (H, KD)
    wq_p = jnp.asarray(wq, input_dtype)                              # (H, QD)
    bias = (jnp.asarray(bk, jnp.float32)
            + jnp.asarray(bq, jnp.float32))[:, None]                 # (H, 1)
    v2 = jnp.asarray(v, jnp.float32)[:, None]                        # (H, 1)

    grid = (B // Bt, S // S_t)

    def _call(edtype, limit):
        kernel = functools.partial(_additive_attn_kernel, elem_dtype=edtype)
        return pl.pallas_call(
            kernel,
            out_shape=jax.ShapeDtypeStruct((B, M, S), jnp.float32),
            grid_spec=pltpu.PrefetchScalarGridSpec(
                num_scalar_prefetch=0,
                grid=grid,
                in_specs=[
                    pl.BlockSpec((Bt, M, KD, S_t), lambda b, s: (b, 0, 0, s)),
                    pl.BlockSpec((Bt, QD, S_t), lambda b, s: (b, 0, s)),
                    pl.BlockSpec((H, KD), lambda b, s: (0, 0)),
                    pl.BlockSpec((H, QD), lambda b, s: (0, 0)),
                    pl.BlockSpec((H, 1), lambda b, s: (0, 0)),
                    pl.BlockSpec((H, 1), lambda b, s: (0, 0)),
                ],
                out_specs=pl.BlockSpec((Bt, M, S_t), lambda b, s: (b, 0, s)),
            ),
            compiler_params=pltpu.CompilerParams(
                dimension_semantics=("parallel", "parallel"),
                vmem_limit_bytes=limit),
        )(key_t, query_t, wk_p, wq_p, bias, v2)

    try:
        out_bms = _call(elem_dtype, vmem_limit)
    except Exception:
        # Fallback guards only the generation-gated knobs (bf16 elementwise /
        # raised vmem limit); the f32 path below lowers on every TPU generation.
        out_bms = _call(jnp.float32, None)

    # torch: attn_weights.permute(2, 0, 1) on (B, M, S) -> (S, B, M).
    # TODO(synk): drop this transpose / emit bf16 if the consumer accepts (B, M, S).
    return jnp.transpose(out_bms, (2, 0, 1))


# --------------------------------------------------------------------------- #
# Reference + self-test
# --------------------------------------------------------------------------- #
def _reference(key, query, wk, bk, wq, bq, v):
    key_proj = jnp.einsum('bmsk,hk->bmsh', key, wk) + bk
    query_proj = jnp.einsum('bsq,hq->bsh', query, wq) + bq
    energy = jnp.tanh(key_proj + query_proj[:, None, :, :])
    energy = jnp.sum(v * energy, axis=-1)          # (B, M, S)
    attn = jax.nn.softmax(energy, axis=1)
    return jnp.transpose(attn, (2, 0, 1))          # (S, B, M)


if __name__ == "__main__":
    def run_case(B, M, S, key_dim, query_dim, hidden):
        ks = jax.random.split(jax.random.PRNGKey(0), 7)
        key_in = jax.random.normal(ks[0], (B, M, S, key_dim), jnp.float32)
        query_in = jax.random.normal(ks[1], (B, S, query_dim), jnp.float32)
        wk = jax.random.normal(ks[2], (hidden, key_dim), jnp.float32) * 0.1
        bk = jax.random.normal(ks[3], (hidden,), jnp.float32) * 0.1
        wq = jax.random.normal(ks[4], (hidden, query_dim), jnp.float32) * 0.1
        bq = jax.random.normal(ks[5], (hidden,), jnp.float32) * 0.1
        v = jax.random.normal(ks[6], (hidden,), jnp.float32)

        out = jax.block_until_ready(
            additive_attention(key_in, query_in, wk, bk, wq, bq, v))
        ref = _reference(key_in, query_in, wk, bk, wq, bq, v)
        assert out.shape == (S, B, M), out.shape
        # Softmax rows must sum to 1 over the modality axis.
        assert jnp.allclose(jnp.sum(out, axis=-1), 1.0, atol=5e-3)
        # bf16 activations (+ bf16 tanh on v6e/v7x) vs the pure-f32 reference.
        assert jnp.allclose(out, ref, atol=3e-2, rtol=3e-2), "mismatch vs reference"

    run_case(2, 4, 8, 16, 16, 32)     # tiny edge case: S_t = S = 8 (padded lanes)
    run_case(2, 4, 128, 16, 16, 32)   # lane-dense main path: S_t = 128
    print("KERNEL_OK")
</pallas_src>

<mosaic_0001>
module attributes {stable_mosaic.version = 11 : i64} {
  func.func @_additive_attn_kernel(%arg0: i32, %arg1: i32, %arg2: memref<1x4x16x8xbf16, #tpu.memory_space<vmem>>, %arg3: memref<1x16x8xbf16, #tpu.memory_space<vmem>>, %arg4: memref<32x16xbf16, #tpu.memory_space<vmem>>, %arg5: memref<32x16xbf16, #tpu.memory_space<vmem>>, %arg6: memref<32x1xf32, #tpu.memory_space<vmem>>, %arg7: memref<32x1xf32, #tpu.memory_space<vmem>>, %arg8: memref<1x4x8xf32, #tpu.memory_space<vmem>>) attributes {dimension_semantics = [#tpu.dimension_semantics<parallel>, #tpu.dimension_semantics<parallel>], iteration_bounds = array<i64: 2, 1>, scalar_prefetch = 0 : i64, scratch_operands = 0 : i64, tpu.core_type = #tpu.core_type<tc>, window_params = [{transform_indices = @transform_0, window_bounds = array<i64: 1, 4, 16, 8>}, {transform_indices = @transform_1, window_bounds = array<i64: 1, 16, 8>}, {pipeline_mode = #tpu.pipeline_mode<synchronous>, transform_indices = @transform_2, window_bounds = array<i64: 32, 16>}, {pipeline_mode = #tpu.pipeline_mode<synchronous>, transform_indices = @transform_3, window_bounds = array<i64: 32, 16>}, {pipeline_mode = #tpu.pipeline_mode<synchronous>, transform_indices = @transform_4, window_bounds = array<i64: 32, 1>}, {pipeline_mode = #tpu.pipeline_mode<synchronous>, transform_indices = @transform_5, window_bounds = array<i64: 32, 1>}, {transform_indices = @transform_6, window_bounds = array<i64: 1, 4, 8>}]} {
    %c0 = arith.constant 0 : index
    %c0_0 = arith.constant 0 : index
    %c0_1 = arith.constant 0 : index
    %c0_2 = arith.constant 0 : index
    %0 = vector.load %arg2[%c0, %c0_0, %c0_1, %c0_2] : memref<1x4x16x8xbf16, #tpu.memory_space<vmem>>, vector<1x4x16x8xbf16>
    %1 = vector.shape_cast %0 : vector<1x4x16x8xbf16> to vector<4x16x8xbf16>
    %c0_3 = arith.constant 0 : index
    %c0_4 = arith.constant 0 : index
    %2 = vector.load %arg4[%c0_3, %c0_4] : memref<32x16xbf16, #tpu.memory_space<vmem>>, vector<32x16xbf16>
    %3 = vector.shape_cast %2 : vector<32x16xbf16> to vector<1x32x16xbf16>
    %4 = vector.broadcast %3 : vector<1x32x16xbf16> to vector<4x32x16xbf16>
    "tpu.trace_start"() <{level = 10 : i32, message = "ghk,gks->ghs"}> : () -> ()
    %cst = arith.constant dense<0.000000e+00> : vector<4x32x8xf32>
    %5 = tpu.matmul %4, %1, %cst {dimension_numbers = #tpu.dot_dimension_numbers<[2], [1], [1], [2], [0, 0, 0, 1, 1, 2], [0], [0]>} : vector<4x32x16xbf16>, vector<4x16x8xbf16>, vector<4x32x8xf32> -> vector<4x32x8xf32>
    "tpu.trace_stop"() : () -> ()
    %c0_5 = arith.constant 0 : index
    %c0_6 = arith.constant 0 : index
    %6 = vector.load %arg5[%c0_5, %c0_6] : memref<32x16xbf16, #tpu.memory_space<vmem>>, vector<32x16xbf16>
    %7 = vector.shape_cast %6 : vector<32x16xbf16> to vector<1x32x16xbf16>
    %c0_7 = arith.constant 0 : index
    %c0_8 = arith.constant 0 : index
    %c0_9 = arith.constant 0 : index
    %8 = vector.load %arg3[%c0_7, %c0_8, %c0_9] : memref<1x16x8xbf16, #tpu.memory_space<vmem>>, vector<1x16x8xbf16>
    "tpu.trace_start"() <{level = 10 : i32, message = "bhq,bqs->bhs"}> : () -> ()
    %cst_10 = arith.constant dense<0.000000e+00> : vector<1x32x8xf32>
    %9 = tpu.matmul %7, %8, %cst_10 {dimension_numbers = #tpu.dot_dimension_numbers<[2], [1], [1], [2], [0, 0, 0, 1, 1, 2], [0], [0]>} : vector<1x32x16xbf16>, vector<1x16x8xbf16>, vector<1x32x8xf32> -> vector<1x32x8xf32>
    "tpu.trace_stop"() : () -> ()
    %c0_11 = arith.constant 0 : index
    %c0_12 = arith.constant 0 : index
    %10 = vector.load %arg6[%c0_11, %c0_12] : memref<32x1xf32, #tpu.memory_space<vmem>>, vector<32x1xf32>
    %11 = vector.shape_cast %10 : vector<32x1xf32> to vector<1x32x1xf32>
    %12 = vector.broadcast %11 : vector<1x32x1xf32> to vector<1x32x8xf32>
    %13 = arith.addf %9, %12 : vector<1x32x8xf32>
    %14 = vector.shape_cast %5 : vector<4x32x8xf32> to vector<1x4x32x8xf32>
    %15 = vector.shape_cast %13 : vector<1x32x8xf32> to vector<1x1x32x8xf32>
    %16 = vector.broadcast %15 : vector<1x1x32x8xf32> to vector<1x4x32x8xf32>
    %17 = arith.addf %14, %16 : vector<1x4x32x8xf32>
    %18 = math.tanh %17 : vector<1x4x32x8xf32>
    %c0_13 = arith.constant 0 : index
    %c0_14 = arith.constant 0 : index
    %19 = vector.load %arg7[%c0_13, %c0_14] : memref<32x1xf32, #tpu.memory_space<vmem>>, vector<32x1xf32>
    %20 = vector.shape_cast %19 : vector<32x1xf32> to vector<1x1x32x1xf32>
    %21 = vector.broadcast %20 : vector<1x1x32x1xf32> to vector<1x4x32x8xf32>
    %22 = arith.mulf %18, %21 : vector<1x4x32x8xf32>
    %cst_15 = arith.constant dense<0.000000e+00> : vector<1x4x8xf32>
    %23 = vector.multi_reduction <add>, %22, %cst_15 [2] : vector<1x4x32x8xf32> to vector<1x4x8xf32>
    %cst_16 = arith.constant dense<0xFF800000> : vector<1x8xf32>
    %24 = vector.multi_reduction <maximumf>, %23, %cst_16 [1] : vector<1x4x8xf32> to vector<1x8xf32>
    %25 = vector.shape_cast %24 : vector<1x8xf32> to vector<1x1x8xf32>
    %26 = vector.broadcast %25 : vector<1x1x8xf32> to vector<1x4x8xf32>
    %27 = arith.subf %23, %26 : vector<1x4x8xf32>
    %28 = math.exp %27 : vector<1x4x8xf32>
    %cst_17 = arith.constant dense<0.000000e+00> : vector<1x8xf32>
    %29 = vector.multi_reduction <add>, %28, %cst_17 [1] : vector<1x4x8xf32> to vector<1x8xf32>
    %30 = vector.shape_cast %29 : vector<1x8xf32> to vector<1x1x8xf32>
    %31 = tpu.reciprocal %30 {approx = true} : vector<1x1x8xf32> -> vector<1x1x8xf32>
    %32 = vector.broadcast %31 : vector<1x1x8xf32> to vector<1x4x8xf32>
    %33 = arith.mulf %28, %32 : vector<1x4x8xf32>
    %c0_18 = arith.constant 0 : index
    %c0_19 = arith.constant 0 : index
    %c0_20 = arith.constant 0 : index
    %34 = vector.load %arg8[%c0_18, %c0_19, %c0_20] : memref<1x4x8xf32, #tpu.memory_space<vmem>>, vector<1x4x8xf32>
    tpu.vector_store %arg8[%c0_18, %c0_19, %c0_20], %33 {strides = array<i32>} : memref<1x4x8xf32, #tpu.memory_space<vmem>>, vector<1x4x8xf32>,
    return
  }
  func.func @transform_0(%arg0: i32, %arg1: i32) -> (i32, i32, i32, i32) {
    %c0_i32 = arith.constant 0 : i32
    %c0_i32_0 = arith.constant 0 : i32
    %c0_i32_1 = arith.constant 0 : i32
    return %arg0, %c0_i32, %c0_i32_0, %arg1 : i32, i32, i32, i32
  }
  func.func @transform_1(%arg0: i32, %arg1: i32) -> (i32, i32, i32) {
    %c0_i32 = arith.constant 0 : i32
    %c0_i32_0 = arith.constant 0 : i32
    return %arg0, %c0_i32, %arg1 : i32, i32, i32
  }
  func.func @transform_2(%arg0: i32, %arg1: i32) -> (i32, i32) {
    %c0_i32 = arith.constant 0 : i32
    %c0_i32_0 = arith.constant 0 : i32
    %c0_i32_1 = arith.constant 0 : i32
    return %c0_i32, %c0_i32_0 : i32, i32
  }
  func.func @transform_3(%arg0: i32, %arg1: i32) -> (i32, i32) {
    %c0_i32 = arith.constant 0 : i32
    %c0_i32_0 = arith.constant 0 : i32
    %c0_i32_1 = arith.constant 0 : i32
    return %c0_i32, %c0_i32_0 : i32, i32
  }
  func.func @transform_4(%arg0: i32, %arg1: i32) -> (i32, i32) {
    %c0_i32 = arith.constant 0 : i32
    %c0_i32_0 = arith.constant 0 : i32
    %c0_i32_1 = arith.constant 0 : i32
    return %c0_i32, %c0_i32_0 : i32, i32
  }
  func.func @transform_5(%arg0: i32, %arg1: i32) -> (i32, i32) {
    %c0_i32 = arith.constant 0 : i32
    %c0_i32_0 = arith.constant 0 : i32
    %c0_i32_1 = arith.constant 0 : i32
    return %c0_i32, %c0_i32_0 : i32, i32
  }
  func.func @transform_6(%arg0: i32, %arg1: i32) -> (i32, i32, i32) {
    %c0_i32 = arith.constant 0 : i32
    %c0_i32_0 = arith.constant 0 : i32
    return %arg0, %c0_i32, %arg1 : i32, i32, i32
  }
}

module attributes {stable_mosaic.version = 11 : i64} {
  func.func @_additive_attn_kernel(%arg0: i32, %arg1: i32, %arg2: memref<1x4x16x8xbf16, #tpu.memory_space<vmem>>, %arg3: memref<1x16x8xbf16, #tpu.memory_space<vmem>>, %arg4: memref<32x16xbf16, #tpu.memory_space<vmem>>, %arg5: memref<32x16xbf16, #tpu.memory_space<vmem>>, %arg6: memref<32x1xf32, #tpu.memory_space<vmem>>, %arg7: memref<32x1xf32, #tpu.memory_space<vmem>>, %arg8: memref<1x4x8xf32, #tpu.memory_space<vmem>>) attributes {dimension_semantics = [#tpu.dimension_semantics<parallel>, #tpu.dimension_semantics<parallel>], iteration_bounds = array<i64: 2, 1>, scalar_prefetch = 0 : i64, scratch_operands = 0 : i64, tpu.core_type = #tpu.core_type<tc>, window_params = [{transform_indices = @transform_0, window_bounds = array<i64: 1, 4, 16, 8>}, {transform_indices = @transform_1, window_bounds = array<i64: 1, 16, 8>}, {pipeline_mode = #tpu.pipeline_mode<synchronous>, transform_indices = @transform_2, window_bounds = array<i64: 32, 16>}, {pipeline_mode = #tpu.pipeline_mode<synchronous>, transform_indices = @transform_3, window_bounds = array<i64: 32, 16>}, {pipeline_mode = #tpu.pipeline_mode<synchronous>, transform_indices = @transform_4, window_bounds = array<i64: 32, 1>}, {pipeline_mode = #tpu.pipeline_mode<synchronous>, transform_indices = @transform_5, window_bounds = array<i64: 32, 1>}, {transform_indices = @transform_6, window_bounds = array<i64: 1, 4, 8>}]} {
    %c0 = arith.constant 0 : index
    %c0_0 = arith.constant 0 : index
    %c0_1 = arith.constant 0 : index
    %c0_2 = arith.constant 0 : index
    %0 = vector.load %arg2[%c0, %c0_0, %c0_1, %c0_2] : memref<1x4x16x8xbf16, #tpu.memory_space<vmem>>, vector<1x4x16x8xbf16>
    %1 = vector.shape_cast %0 : vector<1x4x16x8xbf16> to vector<4x16x8xbf16>
    %c0_3 = arith.constant 0 : index
    %c0_4 = arith.constant 0 : index
    %2 = vector.load %arg4[%c0_3, %c0_4] : memref<32x16xbf16, #tpu.memory_space<vmem>>, vector<32x16xbf16>
    %3 = vector.shape_cast %2 : vector<32x16xbf16> to vector<1x32x16xbf16>
    %4 = vector.broadcast %3 : vector<1x32x16xbf16> to vector<4x32x16xbf16>
    "tpu.trace_start"() <{level = 10 : i32, message = "ghk,gks->ghs"}> : () -> ()
    %cst = arith.constant dense<0.000000e+00> : vector<4x32x8xf32>
    %5 = tpu.matmul %4, %1, %cst {dimension_numbers = #tpu.dot_dimension_numbers<[2], [1], [1], [2], [0, 0, 0, 1, 1, 2], [0], [0]>} : vector<4x32x16xbf16>, vector<4x16x8xbf16>, vector<4x32x8xf32> -> vector<4x32x8xf32>
    "tpu.trace_stop"() : () -> ()
    %c0_5 = arith.constant 0 : index
    %c0_6 = arith.constant 0 : index
    %6 = vector.load %arg5[%c0_5, %c0_6] : memref<32x16xbf16, #tpu.memory_space<vmem>>, vector<32x16xbf16>
    %7 = vector.shape_cast %6 : vector<32x16xbf16> to vector<1x32x16xbf16>
    %c0_7 = arith.constant 0 : index
    %c0_8 = arith.constant 0 : index
    %c0_9 = arith.constant 0 : index
    %8 = vector.load %arg3[%c0_7, %c0_8, %c0_9] : memref<1x16x8xbf16, #tpu.memory_space<vmem>>, vector<1x16x8xbf16>
    "tpu.trace_start"() <{level = 10 : i32, message = "bhq,bqs->bhs"}> : () -> ()
    %cst_10 = arith.constant dense<0.000000e+00> : vector<1x32x8xf32>
    %9 = tpu.matmul %7, %8, %cst_10 {dimension_numbers = #tpu.dot_dimension_numbers<[2], [1], [1], [2], [0, 0, 0, 1, 1, 2], [0], [0]>} : vector<1x32x16xbf16>, vector<1x16x8xbf16>, vector<1x32x8xf32> -> vector<1x32x8xf32>
    "tpu.trace_stop"() : () -> ()
    %c0_11 = arith.constant 0 : index
    %c0_12 = arith.constant 0 : index
    %10 = vector.load %arg6[%c0_11, %c0_12] : memref<32x1xf32, #tpu.memory_space<vmem>>, vector<32x1xf32>
    %11 = vector.shape_cast %10 : vector<32x1xf32> to vector<1x32x1xf32>
    %12 = vector.broadcast %11 : vector<1x32x1xf32> to vector<1x32x8xf32>
    %13 = arith.addf %9, %12 : vector<1x32x8xf32>
    %14 = vector.shape_cast %5 : vector<4x32x8xf32> to vector<1x4x32x8xf32>
    %15 = vector.shape_cast %13 : vector<1x32x8xf32> to vector<1x1x32x8xf32>
    %16 = vector.broadcast %15 : vector<1x1x32x8xf32> to vector<1x4x32x8xf32>
    %17 = arith.addf %14, %16 : vector<1x4x32x8xf32>
    %18 = math.tanh %17 : vector<1x4x32x8xf32>
    %c0_13 = arith.constant 0 : index
    %c0_14 = arith.constant 0 : index
    %19 = vector.load %arg7[%c0_13, %c0_14] : memref<32x1xf32, #tpu.memory_space<vmem>>, vector<32x1xf32>
    %20 = vector.shape_cast %19 : vector<32x1xf32> to vector<1x1x32x1xf32>
    %21 = vector.broadcast %20 : vector<1x1x32x1xf32> to vector<1x4x32x8xf32>
    %22 = arith.mulf %18, %21 : vector<1x4x32x8xf32>
    %cst_15 = arith.constant dense<0.000000e+00> : vector<1x4x8xf32>
    %23 = vector.multi_reduction <add>, %22, %cst_15 [2] : vector<1x4x32x8xf32> to vector<1x4x8xf32>
    %cst_16 = arith.constant dense<0xFF800000> : vector<1x8xf32>
    %24 = vector.multi_reduction <maximumf>, %23, %cst_16 [1] : vector<1x4x8xf32> to vector<1x8xf32>
    %25 = vector.shape_cast %24 : vector<1x8xf32> to vector<1x1x8xf32>
    %26 = vector.broadcast %25 : vector<1x1x8xf32> to vector<1x4x8xf32>
    %27 = arith.subf %23, %26 : vector<1x4x8xf32>
    %28 = math.exp %27 : vector<1x4x8xf32>
    %cst_17 = arith.constant dense<0.000000e+00> : vector<1x8xf32>
    %29 = vector.multi_reduction <add>, %28, %cst_17 [1] : vector<1x4x8xf32> to vector<1x8xf32>
    %30 = vector.shape_cast %29 : vector<1x8xf32> to vector<1x1x8xf32>
    %31 = tpu.reciprocal %30 {approx = true} : vector<1x1x8xf32> -> vector<1x1x8xf32>
    %32 = vector.broadcast %31 : vector<1x1x8xf32> to vector<1x4x8xf32>
    %33 = arith.mulf %28, %32 : vector<1x4x8xf32>
    %c0_18 = arith.constant 0 : index
    %c0_19 = arith.constant 0 : index
    %c0_20 = arith.constant 0 : index
    %34 = vector.load %arg8[%c0_18, %c0_19, %c0_20] : memref<1x4x8xf32, #tpu.memory_space<vmem>>, vector<1x4x8xf32>
    tpu.vector_store %arg8[%c0_18, %c0_19, %c0_20], %33 {strides = array<i32>} : memref<1x4x8xf32, #tpu.memory_space<vmem>>, vector<1x4x8xf32>,
    return
  }
  func.func @transform_0(%arg0: i32, %arg1: i32) -> (i32, i32, i32, i32) {
    %c0_i32 = arith.constant 0 : i32
    %c0_i32_0 = arith.constant 0 : i32
    %c0_i32_1 = arith.constant 0 : i32
    return %arg0, %c0_i32, %c0_i32_0, %arg1 : i32, i32, i32, i32
  }
  func.func @transform_1(%arg0: i32, %arg1: i32) -> (i32, i32, i32) {
    %c0_i32 = arith.constant 0 : i32
    %c0_i32_0 = arith.constant 0 : i32
    return %arg0, %c0_i32, %arg1 : i32, i32, i32
  }
  func.func @transform_2(%arg0: i32, %arg1: i32) -> (i32, i32) {
    %c0_i32 = arith.constant 0 : i32
    %c0_i32_0 = arith.constant 0 : i32
    %c0_i32_1 = arith.constant 0 : i32
    return %c0_i32, %c0_i32_0 : i32, i32
  }
  func.func @transform_3(%arg0: i32, %arg1: i32) -> (i32, i32) {
    %c0_i32 = arith.constant 0 : i32
    %c0_i32_0 = arith.constant 0 : i32
    %c0_i32_1 = arith.constant 0 : i32
    return %c0_i32, %c0_i32_0 : i32, i32
  }
  func.func @transform_4(%arg0: i32, %arg1: i32) -> (i32, i32) {
    %c0_i32 = arith.constant 0 : i32
    %c0_i32_0 = arith.constant 0 : i32
    %c0_i32_1 = arith.constant 0 : i32
    return %c0_i32, %c0_i32_0 : i32, i32
  }
  func.func @transform_5(%arg0: i32, %arg1: i32) -> (i32, i32) {
    %c0_i32 = arith.constant 0 : i32
    %c0_i32_0 = arith.constant 0 : i32
    %c0_i32_1 = arith.constant 0 : i32
    return %c0_i32, %c0_i32_0 : i32, i32
  }
  func.func @transform_6(%arg0: i32, %arg1: i32) -> (i32, i32, i32) {
    %c0_i32 = arith.constant 0 : i32
    %c0_i32_0 = arith.constant 0 : i32
    return %arg0, %c0_i32, %arg1 : i32, i32, i32
  }
}

</mosaic_0001>

<bundles_post_ra>
// kernel: tpu_custom_call.1
= control target key start
LH: loop header
LB: loop body
LE: loop exit
PB: predicated region body
PF: predicated region fallthrough
CT: control target
= control target key end

     0   :  { %11 = vsyncpa [#allocation3], 0  ;;  %s1446_s0 = inlined_call_operand.vmem [shape: bf16[2,4,16,8], index: 0, kind: input, shape index: {}]   ;;  %s1447_s1 = inlined_call_operand.vmem [shape: bf16[2,16,8], index: 1, kind: input, shape index: {}]   ;;  %s1448_s2 = inlined_call_operand.vmem [shape: bf16[32,16], index: 2, kind: input, shape index: {}]   ;;  %s1449_s3 = inlined_call_operand.vmem [shape: bf16[32,16], index: 3, kind: input, shape index: {}]   ;;  %s1450_s4 = inlined_call_operand.vmem [shape: f32[32,1], index: 4, kind: input, shape index: {}]   ;;  %s1451_s5 = inlined_call_operand.vmem [shape: f32[32,1], index: 5, kind: input, shape index: {}]   ;;  %s1452_s6 = inlined_call_operand.hbm [shape: f32[2,4,8], index: 6, kind: output, shape index: {}]  }
   0x1   :  { %13 = vsyncpa [#allocation3 + $0x1], 0  ;;  %s1257_s21 = smov 0   ;;  %s1259_s22 = smov 0  }
   0x2   :  { %s1261_s23 = smov 0   ;;  %s1263_s24 = smov 0  }
   0x3   :  { %s1265_s25 = smov 0   ;;  %s1267_s26 = smov 0  }
   0x4 LB: > { %s951_s27 = sadd.s32 4294967295, %s1218_s26   ;;  %s952_s28 = sadd.s32 4294967294, %s1218_s26   ;;  %s1218_s26 = sphi %s1267_s26, %s19_s26   ;;  %s1214_s25 = sphi %s1265_s25, %s1459_s25   ;;  %s1210_s24 = sphi %s1263_s24, %s1458_s24   ;;  %s1206_s23 = sphi %s1261_s23, %s1457_s23   ;;  %s1202_s22 = sphi %s1259_s22, %s1456_s22   ;;  %s1198_s21 = sphi %s1257_s21, %s1455_s21  }
   0x5   : > { %s31_s29 = sadd.s32 1, %s1214_s25  ;;  %s180_s30 = sadd.s32 1, %s1206_s23 }
   0x6   : > { %p33_p0 = scmp.ge.s32.totalorder %s31_s29, 2  ;;  %p190_p1 = scmp.ne.s32.totalorder %s1206_s23, %s1202_s22 }
   0x7   : > { %p191_p2 = scmp.eq.s32.totalorder %s951_s27, 1  ;;  %p196_p3 = scmp.ne.s32.totalorder %s1202_s22, %s1198_s21 }
   0x8   : > { %s1461_s29 = smov (%p33_p0, %s31_s29), 0  ;;  %p197_p5 = scmp.eq.s32.totalorder %s952_s28, 1 }
   0x9   : > { %p1297_p4 = por %p191_p2, %p190_p1  ;;  %s175_s8 = ssub.s32 %s1214_s25, %s1461_s29 }
   0xa   : > { %p955_p6 = scmp.ge.s32.totalorder %s1218_s26, 1  ;;  %p178_p7 = scmp.eq.s32.totalorder %s175_s8, 0 }
   0xb   : > { %p1304_p8 = por %p197_p5, %p196_p3  ;;  %p249_p9 = scmp.lt.s32.totalorder %s1218_s26, 3 }
   0xc   : > { %s1310_s10 = scalar_select %p178_p7, %s1206_s23, %s180_s30  }
   0xd   : > { %p250_p10 = pnand %p955_p6, %p249_p9 }
   0xe   : > { %p290_p11 = scmp.lt.s32.totalorder (!%p250_p10), %s1210_s24, 1  ;;  %v1090_v0 = vld [vmem:[%s1448_s2] sm:$0xff] (!%p250_p10)   ;;  %vm335_vm0 = vcmask (!%p250_p10), 130048   ;;  %v1220_v1 = vmov (!%p250_p10), 0   ;;  %v564_v3 = vld [vmem:[%s1450_s4 + $0x10] sm:$0xff] (!%p250_p10)  ;;  %v563_v4 = vld [vmem:[%s1450_s4 + $0x8] sm:$0xff] (!%p250_p10) }
   0xf   : > { %253 = sbr.rel (%p250_p10) target bundleno = 383 (0x17f), region = 44  ;;  %1003 = vmatprep.mubr.msk.bf16.mxu0 (!%p250_p10), %vm335_vm0, %v1090_v0  ;;  %1009 = vmatprep.mubr.msk.bf16.mxu1 (!%p250_p10), %vm335_vm0, %v1090_v0  ;;  %v562_v2 = vld [vmem:[%s1450_s4] sm:$0xff] (!%p250_p10)  ;;  %v1091_v6 = vld [vmem:[%s1448_s2 + $0x8] sm:$0xff] (!%p250_p10)   ;;  %v565_v7 = vld [vmem:[%s1450_s4 + $0x18] sm:$0xff] (!%p250_p10)  ;;  %vm729_vm1 = vcmask (!%p250_p10), 64512   ;;  %vm806_vm2 = vcmask (!%p250_p10), 1041409  }
  0x10   : > { %1087 = vset.pattern.permute.xlu0 (!%p250_p10), %v1220_v1  ;;  %1088 = vset.pattern.permute.xlu1 (!%p250_p10), %v1220_v1  ;;  %v689_v12 = vld [vmem:[%s1451_s5] sm:$0xff] (!%p250_p10)  ;;  %v690_v13 = vld [vmem:[%s1451_s5 + $0x8] sm:$0xff] (!%p250_p10)  ;;  %v691_v15 = vld [vmem:[%s1451_s5 + $0x10] sm:$0xff] (!%p250_p10)  ;;  %vm809_vm3 = vcmask (!%p250_p10), 1042434   ;;  %vm812_vm4 = vcmask (!%p250_p10), 1043459   ;;  %vm815_vm5 = vcmask (!%p250_p10), 60416  }
  0x11   : > { %568 = vperm.xlu0 (!%p250_p10), %1087, %v562_v2   ;;  %578 = vperm.xlu1 (!%p250_p10), %1088, %v564_v3   ;;  %v1096_v14 = vld [vmem:[%s1449_s3] sm:$0xff] (!%p250_p10)   ;;  %v692_v16 = vld [vmem:[%s1451_s5 + $0x18] sm:$0xff] (!%p250_p10)  ;;  %v1097_v17 = vld [vmem:[%s1449_s3 + $0x8] sm:$0xff] (!%p250_p10)   ;;  %s287_s18 = sand.u32 (!%p250_p10), 1, %s1202_s22   ;;  %s1221_s11 = smov (!%p250_p10), [#allocation2]  }
  0x12   : > { %s956_s19 = sshll.u32 (!%p250_p10), %s287_s18, 2  ;;  %s1144_s12 = sshll.u32 (!%p250_p10), %s1221_s11, 4  ;;  %s1145_s12 = int_to_ptr.vmem [resolvable:$false] %s1144_s12 }
  0x15   : > { %573 = vperm.xlu0 (!%p250_p10), %1087, %v563_v4   ;;  %583 = vperm.xlu1 (!%p250_p10), %1088, %v565_v7  }
  0x16   : > { %s291_s13 = scalar_select %p290_p11, %s1210_s24, 1 }
  0x18   : > { %s984_s14 = sshll.u32 %s291_s13, 5  ;;  %s985_s15 = sshll.u32 %s291_s13, 3 }
  0x19   : > { %s297_s28 = scalar_lea.vmem %s1446_s0, %s984_s14  ;;  %s305_s17 = scalar_lea.vmem %s1447_s1, %s985_s15  ;;  %695 = vperm.xlu0 %1087, %v689_v12   ;;  %700 = vperm.xlu1 %1088, %v690_v13  }
  0x1a   : > { %v1089_v5 = vld [vmem:[%s297_s28] sm:$0xff]   ;;  %v1092_v8 = vld [vmem:[%s297_s28 + $0x10] sm:$0xff]   ;;  %v1093_v9 = vld [vmem:[%s297_s28 + $0x8] sm:$0xff]   ;;  %s981_s14 = sshll.u32 %s1210_s24, 6  ;;  %s289_s15 = scalar_lea.vmem [#allocation2], %s956_s19 }
  0x1b   : > { %1001 = vmatprep.subr.bf16.mxu0 %v1089_v5  ;;  %v1094_v10 = vld [vmem:[%s305_s17] sm:$0xff]   ;;  %1007 = vmatprep.subr.bf16.mxu1 %v1093_v9  ;;  %v1095_v11 = vld [vmem:[%s297_s28 + $0x18] sm:$0xff]   ;;  %s859_s20 = sshll.u32 %s289_s15, 4  ;;  %s1397_s30 = scalar_lea.hbm %s1452_s6, %s981_s14  ;;  %s1399_s20 = int_to_ptr.vmem [resolvable:$true] %s859_s20 }
  0x1c   : > { %1002 = vmatpush3.bf16.msra.mxu0 %v1089_v5  ;;  %1008 = vmatpush3.bf16.msra.mxu1 %v1093_v9  ;;  %s845_s24 = scalar_lea.sflag [#allocation3], %s287_s18  ;;  %s1140_s8 = scalar_lea.vmem %s1399_s20, 64 }
  0x1d   : > { %1013 = vmatprep.subr.bf16.mxu0 %v1092_v8  ;;  %1019 = vmatprep.subr.bf16.mxu1 %v1095_v11  ;;  %p1141_p12 = scmp.ne.s32.totalorder %s1399_s20, %s1140_s8  ;;  %s1146_s13 = scalar_lea.vmem %s1145_s12, 128 }
  0x1e   : > { %705 = vperm.xlu0 %1087, %v691_v15   ;;  %710 = vperm.xlu1 %1088, %v692_v16   ;;  %p1147_p1 = scmp.lt.s32.totalorder %s1399_s20, %s1145_s12  ;;  %p1148_p2 = scmp.lt.s32.totalorder %s1146_s13, %s1140_s8 }
  0x1f   : > { %1004 = vmatmul.mubr.msk.bf16.vlgmr.msra.gmra.mrb[0].mxu0 %vm335_vm0, %v1091_v6  ;;  %1010 = vmatmul.mubr.msk.bf16.vlgmr.msra.gmra.mrb[0].mxu1 %vm335_vm0, %v1091_v6  ;;  %p1142_p13 = pnand %p1141_p12, %p1297_p4 }
  0x20   : > { %1014 = vmatpush3.bf16.msra.mxu0 %v1092_v8  ;;  %1015 = vmatprep.mubr.msk.bf16.mxu0 %vm335_vm0, %v1090_v0  ;;  %p1149_p3 = por %p1148_p2, %p1147_p1 }
  0x21   : > { %1025 = vmatprep.subr.bf16.mxu0 %v1094_v10  ;;  %1020 = vmatpush3.bf16.msra.mxu1 %v1095_v11  ;;  %p1143_p0 = pneg %p1142_p13 }
  0x22   : > { %1021 = vmatprep.mubr.msk.bf16.mxu1 %vm335_vm0, %v1090_v0 }
  0x23   : > { %p1150_p5 = pnand %p1149_p3, %p1143_p0 }
  0x27   : > { %1016 = vmatmul.mubr.msk.bf16.vlgmr.msra.gmra.mrb[4].mxu0 %vm335_vm0, %v1091_v6  ;;  %1022 = vmatmul.mubr.msk.bf16.vlgmr.msra.gmra.mrb[4].mxu1 %vm335_vm0, %v1091_v6 }
  0x28   : > { %1026 = vmatpush3.bf16.msra.mxu0 %v1094_v10  ;;  %1027 = vmatprep.mubr.msk.bf16.mxu0 %vm335_vm0, %v1096_v14 }
  0x2f   : > { %1028 = vmatmul.mubr.msk.bf16.vlgmr.msra.gmra.mrb[8].mxu0 %vm335_vm0, %v1097_v17 }
  0x90   : > { %v569_v34 = vpop.permute.xlu0 %568  ;;  %v579_v35 = vpop.permute.xlu1 %578 }
  0x94   : > { %v574_v46 = vpop.permute.xlu0 %573  ;;  %v584_v47 = vpop.permute.xlu1 %583 }
  0x98   : > { %v696_v1 = vpop.permute.xlu0 %695  ;;  %v701_v8 = vpop.permute.xlu1 %700 }
  0x9d   : > { %v706_v9 = vpop.permute.xlu0 %705 }
  0xf2   : > { %v1005_v18 = vpop.f32.mrb[0].mxu0  ;;  %v1011_v21 = vpop.f32.mrb[0].mxu1 }
  0xf3   : > { %v376_v19 = vpop.f32.mrb[1].mxu0  ;;  %v431_v23 = vpop.f32.mrb[1].mxu1 }
  0xf4   : > { %v1006_v20 = vpop.f32.mrb[2].mxu0  ;;  %v1012_v24 = vpop.f32.mrb[2].mxu1 }
  0xf5   : > { %v379_v22 = vpop.f32.mrb[3].mxu0  ;;  %v434_v25 = vpop.f32.mrb[3].mxu1 }
  0xfa   : > { %v1017_v26 = vpop.f32.mrb[4].mxu0  ;;  %v1023_v29 = vpop.f32.mrb[4].mxu1 }
  0xfb   : > { %v486_v27 = vpop.f32.mrb[5].mxu0  ;;  %v541_v31 = vpop.f32.mrb[5].mxu1 }
  0xfc   : > { %v1018_v28 = vpop.f32.mrb[6].mxu0  ;;  %v1024_v32 = vpop.f32.mrb[6].mxu1 }
  0xfd   : > { %v489_v30 = vpop.f32.mrb[7].mxu0  ;;  %v544_v33 = vpop.f32.mrb[7].mxu1 }
 0x102   : > { %v1029_v36 = vpop.f32.mrb[8].mxu0 }
 0x103   : > { %v651_v37 = vadd.f32 %v1029_v36, %v579_v35  ;;  %v642_v38 = vpop.f32.mrb[9].mxu0 }
 0x104   : > { %v643_v39 = vadd.f32 %v642_v38, %v569_v34  ;;  %v1030_v40 = vpop.f32.mrb[10].mxu0 }
 0x105   : > { %v659_v41 = vadd.f32 %v1005_v18, %v651_v37  ;;  %v663_v42 = vadd.f32 %v1011_v21, %v651_v37  ;;  %v667_v43 = vadd.f32 %v1017_v26, %v651_v37  ;;  %v671_v44 = vadd.f32 %v1023_v29, %v651_v37  ;;  %v645_v45 = vpop.f32.mrb[11].mxu0  ;;  %v711_v26 = vpop.permute.xlu1 %710 }
 0x106   : > { %v657_v48 = vadd.f32 %v643_v39, %v376_v19  ;;  %v661_v49 = vadd.f32 %v643_v39, %v431_v23  ;;  %v665_v50 = vadd.f32 %v643_v39, %v486_v27  ;;  %v669_v51 = vadd.f32 %v643_v39, %v541_v31 }
 0x107   : > { %1098 = vtanh.f32 %v659_v41  ;;  %v654_v52 = vadd.f32 %v1030_v40, %v584_v47  ;;  %v646_v53 = vadd.f32 %v645_v45, %v574_v46 }
 0x108   : > { %1100 = vtanh.f32 %v663_v42 }
 0x109   : > { %1102 = vtanh.f32 %v667_v43  ;;  %v660_v54 = vadd.f32 %v1006_v20, %v654_v52  ;;  %v664_v55 = vadd.f32 %v1012_v24, %v654_v52  ;;  %v668_v56 = vadd.f32 %v1018_v28, %v654_v52 }
 0x10a   : > { %1104 = vtanh.f32 %v671_v44  ;;  %v672_v57 = vadd.f32 %v1024_v32, %v654_v52  ;;  %v658_v58 = vadd.f32 %v646_v53, %v379_v22  ;;  %v662_v59 = vadd.f32 %v646_v53, %v434_v25 }
 0x10b   : > { %1106 = vtanh.f32 %v657_v48  ;;  %v666_v60 = vadd.f32 %v646_v53, %v489_v30  ;;  %v670_v61 = vadd.f32 %v646_v53, %v544_v33 }
 0x10c   : > { %1108 = vtanh.f32 %v661_v49 }
 0x10d   : > { %1110 = vtanh.f32 %v665_v50 }
 0x10e   : > { %1112 = vtanh.f32 %v669_v51 }
 0x10f   : > { %1114 = vtanh.f32 %v660_v54 }
 0x110   : > { %1116 = vtanh.f32 %v664_v55 }
 0x111   : > { %v1099_v62 = vpop.eup %1098  ;;  %1118 = vtanh.f32 %v668_v56 }
 0x112   : > { %v1101_v63 = vpop.eup %1100  ;;  %1120 = vtanh.f32 %v672_v57  ;;  %v715_v11 = vmul.f32 %v1099_v62, %v706_v9 }
 0x113   : > { %v1103_v0 = vpop.eup %1102  ;;  %1122 = vtanh.f32 %v658_v58  ;;  %v719_v15 = vmul.f32 %v1101_v63, %v706_v9 }
 0x114   : > { %v1105_v2 = vpop.eup %1104  ;;  %1124 = vtanh.f32 %v662_v59  ;;  %v723_v19 = vmul.f32 %v1103_v0, %v706_v9  ;;  %v733_v24 = vsel %vm729_vm1, %v715_v11, 0.0 }
 0x115   : > { %v1107_v3 = vpop.eup %1106  ;;  %1126 = vtanh.f32 %v666_v60  ;;  %v727_v23 = vmul.f32 %v1105_v2, %v706_v9  ;;  %v746_v30 = vsel %vm729_vm1, %v719_v15, 0.0 }
 0x116   : > { %v1109_v4 = vpop.eup %1108  ;;  %1128 = vtanh.f32 %v670_v61  ;;  %v713_v13 = vmul.f32 %v1107_v3, %v696_v1  ;;  %v759_v50 = vsel %vm729_vm1, %v723_v19, 0.0 }
 0x117   : > { %v1111_v5 = vpop.eup %1110  ;;  %v717_v14 = vmul.f32 %v1109_v4, %v696_v1  ;;  %v772_v55 = vsel %vm729_vm1, %v727_v23, 0.0 }
 0x118   : > { %v1113_v6 = vpop.eup %1112  ;;  %v721_v17 = vmul.f32 %v1111_v5, %v696_v1  ;;  %v730_v28 = vsel %vm729_vm1, %v713_v13, 0.0 }
 0x119   : > { %v1115_v7 = vpop.eup %1114  ;;  %v725_v22 = vmul.f32 %v1113_v6, %v696_v1  ;;  %v743_v29 = vsel %vm729_vm1, %v717_v14, 0.0 }
 0x11a   : > { %v1117_v10 = vpop.eup %1116  ;;  %v716_v32 = vmul.f32 %v1115_v7, %v711_v26  ;;  %v756_v35 = vsel %vm729_vm1, %v721_v17, 0.0 }
 0x11b   : > { %v1119_v12 = vpop.eup %1118  ;;  %v720_v36 = vmul.f32 %v1117_v10, %v711_v26  ;;  %v769_v43 = vsel %vm729_vm1, %v725_v22, 0.0 }
 0x11c   : > { %v1121_v16 = vpop.eup %1120  ;;  %v724_v40 = vmul.f32 %v1119_v12, %v711_v26  ;;  %v735_v48 = vsel %vm729_vm1, %v716_v32, 0.0 }
 0x11d   : > { %v1123_v18 = vpop.eup %1122  ;;  %v728_v44 = vmul.f32 %v1121_v16, %v711_v26  ;;  %v748_v53 = vsel %vm729_vm1, %v720_v36, 0.0 }
 0x11e   : > { %v1125_v20 = vpop.eup %1124  ;;  %v714_v21 = vmul.f32 %v1123_v18, %v701_v8  ;;  %v761_v57 = vsel %vm729_vm1, %v724_v40, 0.0 }
 0x11f   : > { %v1127_v25 = vpop.eup %1126  ;;  %v718_v27 = vmul.f32 %v1125_v20, %v701_v8  ;;  %v774_v61 = vsel %vm729_vm1, %v728_v44, 0.0 }
 0x120   : > { %v1129_v31 = vpop.eup %1128  ;;  %v722_v33 = vmul.f32 %v1127_v25, %v701_v8  ;;  %v731_v34 = vsel %vm729_vm1, %v714_v21, 0.0 }
 0x121   : > { %v726_v37 = vmul.f32 %v1129_v31, %v701_v8  ;;  %v732_v38 = vadd.f32 %v731_v34, %v730_v28  ;;  %v744_v39 = vsel %vm729_vm1, %v718_v27, 0.0 }
 0x122   : > { %v745_v41 = vadd.f32 %v744_v39, %v743_v29  ;;  %v757_v42 = vsel %vm729_vm1, %v722_v33, 0.0 }
 0x123   : > { %v734_v45 = vadd.f32 %v733_v24, %v732_v38  ;;  %v758_v46 = vadd.f32 %v757_v42, %v756_v35  ;;  %v770_v47 = vsel %vm729_vm1, %v726_v37, 0.0 }
 0x124   : > { %v747_v49 = vadd.f32 %v746_v30, %v745_v41  ;;  %v771_v51 = vadd.f32 %v770_v47, %v769_v43 }
 0x125   : > { %v736_v52 = vadd.f32 %v735_v48, %v734_v45  ;;  %v760_v54 = vadd.f32 %v759_v50, %v758_v46 }
 0x126   : > { %v749_v56 = vadd.f32 %v748_v53, %v747_v49  ;;  %v773_v58 = vadd.f32 %v772_v55, %v771_v51 }
 0x127   : > { %v737_v59 = vrot.slane %v736_v52, 4  ;;  %v762_v60 = vadd.f32 %v761_v57, %v760_v54  ;;  %v824_v54 = vlaneseq }
 0x128   : > { %v750_v62 = vrot.slane %v749_v56, 4  ;;  %v775_v63 = vadd.f32 %v774_v61, %v773_v58 }
 0x129   : > { %v738_v0 = vadd.f32 %v737_v59, %v736_v52  ;;  %v763_v1 = vrot.slane %v762_v60, 4  ;;  %v825_v55 = vshrl.u32 %v824_v54, 7 }
 0x12a   : > { %v751_v2 = vadd.f32 %v750_v62, %v749_v56  ;;  %v776_v3 = vrot.slane %v775_v63, 4 }
 0x12b   : > { %v739_v4 = vrot.slane %v738_v0, 2  ;;  %v764_v5 = vadd.f32 %v763_v1, %v762_v60  ;;  %v826_v56 = vsub.s32 0, %v825_v55 }
 0x12c   : > { %v752_v6 = vrot.slane %v751_v2, 2  ;;  %v777_v7 = vadd.f32 %v776_v3, %v775_v63 }
 0x12d   : > { %v740_v8 = vadd.f32 %v739_v4, %v738_v0  ;;  %v765_v9 = vrot.slane %v764_v5, 2 }
 0x12e   : > { %v753_v10 = vadd.f32 %v752_v6, %v751_v2  ;;  %v778_v11 = vrot.slane %v777_v7, 2 }
 0x12f   : > { %v741_v12 = vrot.slane %v740_v8, 1  ;;  %v766_v13 = vadd.f32 %v765_v9, %v764_v5 }
 0x130   : > { %v754_v14 = vrot.slane %v753_v10, 1  ;;  %v779_v15 = vadd.f32 %v778_v11, %v777_v7 }
 0x131   : > { %v742_v16 = vadd.f32 %v741_v12, %v740_v8  ;;  %v767_v17 = vrot.slane %v766_v13, 1 }
 0x132   : > { %v755_v18 = vadd.f32 %v754_v14, %v753_v10  ;;  %v780_v19 = vrot.slane %v779_v15, 1 }
 0x133   : > { %v768_v20 = vadd.f32 %v767_v17, %v766_v13  ;;  %v782_v21 = vsel %vm729_vm1, %v742_v16, -inf }
 0x134   : > { %v781_v22 = vadd.f32 %v780_v19, %v779_v15  ;;  %v783_v23 = vsel %vm729_vm1, %v755_v18, -inf }
 0x135   : > { %v784_v24 = vsel %vm729_vm1, %v768_v20, -inf  ;;  %v786_v25 = vmax.f32 %v782_v21, %v783_v23 }
 0x136   : > { %v785_v26 = vsel %vm729_vm1, %v781_v22, -inf }
 0x137   : > { %v787_v27 = vmax.f32 %v784_v24, %v785_v26 }
 0x139   : > { %v788_v28 = vmax.f32 %v786_v25, %v787_v27 }
 0x13b   : > { %v789_v29 = vsub.f32 %v742_v16, %v788_v28  ;;  %v790_v30 = vsub.f32 %v755_v18, %v788_v28  ;;  %v791_v31 = vsub.f32 %v768_v20, %v788_v28  ;;  %v792_v32 = vsub.f32 %v781_v22, %v788_v28 }
 0x13d   : > { %v793_v33 = vmul.f32 1.442695, %v789_v29  ;;  %v795_v34 = vmul.f32 1.442695, %v790_v30  ;;  %v797_v35 = vmul.f32 1.442695, %v791_v31 }
 0x13e   : > { %v799_v36 = vmul.f32 1.442695, %v792_v32 }
 0x13f   : > { %1130 = vpow2.f32 %v793_v33 }
 0x140   : > { %1132 = vpow2.f32 %v795_v34 }
 0x141   : > { %1134 = vpow2.f32 %v797_v35 }
 0x142   : > { %1136 = vpow2.f32 %v799_v36 }
 0x149   : > { %v1131_v37 = vpop.eup %1130 }
 0x14a   : > { %v1133_v38 = vpop.eup %1132 }
 0x14b   : > { %v1135_v39 = vpop.eup %1134  ;;  %v805_v40 = vrot.slane %v1133_v38, 7 }
 0x14c   : > { %v1137_v41 = vpop.eup %1136  ;;  %v808_v42 = vrot.slane %v1135_v39, 6 }
 0x14d   : > { %v807_v43 = vsel %vm806_vm2, %v805_v40, %v1131_v37  ;;  %v811_v44 = vrot.slane %v1137_v41, 5 }
 0x14e   : > { %v810_v45 = vsel %vm809_vm3, %v808_v42, %v807_v43 }
 0x14f   : > { %v813_v46 = vsel %vm812_vm4, %v811_v44, %v810_v45 }
 0x150   : > { %v816_v47 = vsel %vm815_vm5, %v813_v46, 0.0 }
 0x151   : > { %v817_v48 = vrot.slane %v816_v47, 4 }
 0x153   : > { %v818_v49 = vadd.f32 %v817_v48, %v816_v47 }
 0x155   : > { %v819_v50 = vrot.slane %v818_v49, 2 }
 0x157   : > { %v820_v51 = vadd.f32 %v819_v50, %v818_v49 }
 0x159   : > { %v821_v52 = vrot.slane %v820_v51, 1 }
 0x15b   : > { %v822_v53 = vadd.f32 %v821_v52, %v820_v51 }
 0x15d   : > { %1138 = vrcp.f32 %v822_v53 }
 0x167   : > { %v1139_v57 = vpop.eup %1138 }
 0x168   : > { %v827_v58 = vrot.slane %v1139_v57, %v826_v56 }
 0x16a   : > { %v828_v59 = vmul.f32 %v1131_v37, %v827_v58  ;;  %v829_v60 = vmul.f32 %v1133_v38, %v827_v58  ;;  %v830_v61 = vmul.f32 %v1135_v39, %v827_v58  ;;  %v831_v62 = vmul.f32 %v1137_v41, %v827_v58 }
 0x16c   : > { %v836_v63 = vrot.slane %v829_v60, 7  ;;  %v838_v0 = vrot.slane %v830_v61, 6  ;;  %v840_v2 = vrot.slane %v831_v62, 5 }
 0x16e   : > { %v837_v1 = vsel %vm806_vm2, %v836_v63, %v828_v59 }
 0x16f   : > { %v839_v3 = vsel %vm809_vm3, %v838_v0, %v837_v1 }
 0x170   : > { %v841_v4 = vsel %vm812_vm4, %v840_v2, %v839_v3 }
 0x171   : > { %843 = vst.msk [vmem:[%s289_s15] sm:$0xf] %vm815_vm5, %v841_v4 }
 0x172   : > { %1153 = shalt.err (!%p1150_p5)
}
 0x173   : > { %s1154_s16 = scalar_lea.hbm %s1397_s30, 64  ;;  %s1158_s19 = scalar_lea.hbm %s1452_s6, 128 }
 0x174   : > { %p1155_p6 = scmp.ne.s32.totalorder %s1397_s30, %s1154_s16  ;;  %p1159_p10 = scmp.lt.u32.totalorder %s1397_s30, %s1452_s6 }
 0x175   : > { %p1160_p11 = scmp.lt.u32.totalorder %s1158_s19, %s1154_s16  ;;  %p1162_p13 = scmp.lt.u32.totalorder %s1154_s16, %s1397_s30 }
 0x176   : > { %p1156_p7 = pnand %p1155_p6, %p1297_p4 }
 0x177   : > { %p1161_p12 = por %p1160_p11, %p1159_p10 }
 0x178   : > { %p1157_p9 = pneg %p1156_p7 }
 0x179   : > { %p1163_p0 = por %p1162_p13, %p1161_p12 }
 0x17b   : > { %p1164_p1 = pnand %p1163_p0, %p1157_p9 }
 0x17d   : > { %1167 = shalt.err (!%p1164_p1)
}
 0x17e   : > { %1031 = dma.vmem_to_hbm [thread:$0]  (%p1297_p4), %s1399_s20, 64, %s1397_s30, %s845_s24  }
 0x17f PF: > { %p1037_p2 = scmp.ge.s32.totalorder %s1218_s26, 2  ;;  %s871_s27 = sand.u32 1, %s1198_s21  }
 0x180   : > { %s872_s28 = scalar_lea.sflag [#allocation3], %s871_s27 }
 0x181   : > { %p1034_p3 = pnand %p1037_p2, %p1304_p8 }
 0x183   : > { %1193 = dma.done.wait (!%p1034_p3), %s872_s28, 64  }
 0x184   : > { %1195 = vsyncadd (!%p1034_p3), %s872_s28, 4294967232  ;;  %s19_s26 = sadd.s32 1, %s1218_s26   ;;  %s1455_s21 = smov %s1202_s22 }
 0x185   : > { %p16_p5 = scmp.ge.s32.totalorder %s19_s26, 4   ;;  %s1456_s22 = smov %s1206_s23 }
 0x186   : > { %s1457_s23 = smov %s1310_s10  ;;  %s1458_s24 = smov %s1214_s25 }
 0x187   : > { %s1459_s25 = smov %s1461_s29  ;;  %18 = sbr.rel (!%p16_p5) target bundleno = 4 (0x4), region = 82 }
 0x18e   :  { %877 = vsyncpa [#allocation3], 1 }
 0x18f   :  { %879 = vsyncpa [#allocation3 + $0x1], 1 }

// kernel: tpu_custom_call.1
= control target key start
LH: loop header
LB: loop body
LE: loop exit
PB: predicated region body
PF: predicated region fallthrough
CT: control target
= control target key end

     0   :  { %11 = vsyncpa [#allocation3], 0  ;;  %s1446_s0 = inlined_call_operand.vmem [shape: bf16[2,4,16,8], index: 0, kind: input, shape index: {}]   ;;  %s1447_s1 = inlined_call_operand.vmem [shape: bf16[2,16,8], index: 1, kind: input, shape index: {}]   ;;  %s1448_s2 = inlined_call_operand.vmem [shape: bf16[32,16], index: 2, kind: input, shape index: {}]   ;;  %s1449_s3 = inlined_call_operand.vmem [shape: bf16[32,16], index: 3, kind: input, shape index: {}]   ;;  %s1450_s4 = inlined_call_operand.vmem [shape: f32[32,1], index: 4, kind: input, shape index: {}]   ;;  %s1451_s5 = inlined_call_operand.vmem [shape: f32[32,1], index: 5, kind: input, shape index: {}]   ;;  %s1452_s6 = inlined_call_operand.hbm [shape: f32[2,4,8], index: 6, kind: output, shape index: {}]  }
   0x1   :  { %13 = vsyncpa [#allocation3 + $0x1], 0  ;;  %s1257_s21 = smov 0   ;;  %s1259_s22 = smov 0  }
   0x2   :  { %s1261_s23 = smov 0   ;;  %s1263_s24 = smov 0  }
   0x3   :  { %s1265_s25 = smov 0   ;;  %s1267_s26 = smov 0  }
   0x4 LB: > { %s951_s27 = sadd.s32 4294967295, %s1218_s26   ;;  %s952_s28 = sadd.s32 4294967294, %s1218_s26   ;;  %s1218_s26 = sphi %s1267_s26, %s19_s26   ;;  %s1214_s25 = sphi %s1265_s25, %s1459_s25   ;;  %s1210_s24 = sphi %s1263_s24, %s1458_s24   ;;  %s1206_s23 = sphi %s1261_s23, %s1457_s23   ;;  %s1202_s22 = sphi %s1259_s22, %s1456_s22   ;;  %s1198_s21 = sphi %s1257_s21, %s1455_s21  }
   0x5   : > { %s31_s29 = sadd.s32 1, %s1214_s25  ;;  %s180_s30 = sadd.s32 1, %s1206_s23 }
   0x6   : > { %p33_p0 = scmp.ge.s32.totalorder %s31_s29, 2  ;;  %p190_p1 = scmp.ne.s32.totalorder %s1206_s23, %s1202_s22 }
   0x7   : > { %p191_p2 = scmp.eq.s32.totalorder %s951_s27, 1  ;;  %p196_p3 = scmp.ne.s32.totalorder %s1202_s22, %s1198_s21 }
   0x8   : > { %s1461_s29 = smov (%p33_p0, %s31_s29), 0  ;;  %p197_p5 = scmp.eq.s32.totalorder %s952_s28, 1 }
   0x9   : > { %p1297_p4 = por %p191_p2, %p190_p1  ;;  %s175_s8 = ssub.s32 %s1214_s25, %s1461_s29 }
   0xa   : > { %p955_p6 = scmp.ge.s32.totalorder %s1218_s26, 1  ;;  %p178_p7 = scmp.eq.s32.totalorder %s175_s8, 0 }
   0xb   : > { %p1304_p8 = por %p197_p5, %p196_p3  ;;  %p249_p9 = scmp.lt.s32.totalorder %s1218_s26, 3 }
   0xc   : > { %s1310_s10 = scalar_select %p178_p7, %s1206_s23, %s180_s30  }
   0xd   : > { %p250_p10 = pnand %p955_p6, %p249_p9 }
   0xe   : > { %p290_p11 = scmp.lt.s32.totalorder (!%p250_p10), %s1210_s24, 1  ;;  %v1090_v0 = vld [vmem:[%s1448_s2] sm:$0xff] (!%p250_p10)   ;;  %vm335_vm0 = vcmask (!%p250_p10), 130048   ;;  %v1220_v1 = vmov (!%p250_p10), 0   ;;  %v564_v3 = vld [vmem:[%s1450_s4 + $0x10] sm:$0xff] (!%p250_p10)  ;;  %v563_v4 = vld [vmem:[%s1450_s4 + $0x8] sm:$0xff] (!%p250_p10) }
   0xf   : > { %253 = sbr.rel (%p250_p10) target bundleno = 383 (0x17f), region = 44  ;;  %1003 = vmatprep.mubr.msk.bf16.mxu0 (!%p250_p10), %vm335_vm0, %v1090_v0  ;;  %1009 = vmatprep.mubr.msk.bf16.mxu1 (!%p250_p10), %vm335_vm0, %v1090_v0  ;;  %v562_v2 = vld [vmem:[%s1450_s4] sm:$0xff] (!%p250_p10)  ;;  %v1091_v6 = vld [vmem:[%s1448_s2 + $0x8] sm:$0xff] (!%p250_p10)   ;;  %v565_v7 = vld [vmem:[%s1450_s4 + $0x18] sm:$0xff] (!%p250_p10)  ;;  %vm729_vm1 = vcmask (!%p250_p10), 64512   ;;  %vm806_vm2 = vcmask (!%p250_p10), 1041409  }
  0x10   : > { %1087 = vset.pattern.permute.xlu0 (!%p250_p10), %v1220_v1  ;;  %1088 = vset.pattern.permute.xlu1 (!%p250_p10), %v1220_v1  ;;  %v689_v12 = vld [vmem:[%s1451_s5] sm:$0xff] (!%p250_p10)  ;;  %v690_v13 = vld [vmem:[%s1451_s5 + $0x8] sm:$0xff] (!%p250_p10)  ;;  %v691_v15 = vld [vmem:[%s1451_s5 + $0x10] sm:$0xff] (!%p250_p10)  ;;  %vm809_vm3 = vcmask (!%p250_p10), 1042434   ;;  %vm812_vm4 = vcmask (!%p250_p10), 1043459   ;;  %vm815_vm5 = vcmask (!%p250_p10), 60416  }
  0x11   : > { %568 = vperm.xlu0 (!%p250_p10), %1087, %v562_v2   ;;  %578 = vperm.xlu1 (!%p250_p10), %1088, %v564_v3   ;;  %v1096_v14 = vld [vmem:[%s1449_s3] sm:$0xff] (!%p250_p10)   ;;  %v692_v16 = vld [vmem:[%s1451_s5 + $0x18] sm:$0xff] (!%p250_p10)  ;;  %v1097_v17 = vld [vmem:[%s1449_s3 + $0x8] sm:$0xff] (!%p250_p10)   ;;  %s287_s18 = sand.u32 (!%p250_p10), 1, %s1202_s22   ;;  %s1221_s11 = smov (!%p250_p10), [#allocation2]  }
  0x12   : > { %s956_s19 = sshll.u32 (!%p250_p10), %s287_s18, 2  ;;  %s1144_s12 = sshll.u32 (!%p250_p10), %s1221_s11, 4  ;;  %s1145_s12 = int_to_ptr.vmem [resolvable:$false] %s1144_s12 }
  0x15   : > { %573 = vperm.xlu0 (!%p250_p10), %1087, %v563_v4   ;;  %583 = vperm.xlu1 (!%p250_p10), %1088, %v565_v7  }
  0x16   : > { %s291_s13 = scalar_select %p290_p11, %s1210_s24, 1 }
  0x18   : > { %s984_s14 = sshll.u32 %s291_s13, 5  ;;  %s985_s15 = sshll.u32 %s291_s13, 3 }
  0x19   : > { %s297_s28 = scalar_lea.vmem %s1446_s0, %s984_s14  ;;  %s305_s17 = scalar_lea.vmem %s1447_s1, %s985_s15  ;;  %695 = vperm.xlu0 %1087, %v689_v12   ;;  %700 = vperm.xlu1 %1088, %v690_v13  }
  0x1a   : > { %v1089_v5 = vld [vmem:[%s297_s28] sm:$0xff]   ;;  %v1092_v8 = vld [vmem:[%s297_s28 + $0x10] sm:$0xff]   ;;  %v1093_v9 = vld [vmem:[%s297_s28 + $0x8] sm:$0xff]   ;;  %s981_s14 = sshll.u32 %s1210_s24, 6  ;;  %s289_s15 = scalar_lea.vmem [#allocation2], %s956_s19 }
  0x1b   : > { %1001 = vmatprep.subr.bf16.mxu0 %v1089_v5  ;;  %v1094_v10 = vld [vmem:[%s305_s17] sm:$0xff]   ;;  %1007 = vmatprep.subr.bf16.mxu1 %v1093_v9  ;;  %v1095_v11 = vld [vmem:[%s297_s28 + $0x18] sm:$0xff]   ;;  %s859_s20 = sshll.u32 %s289_s15, 4  ;;  %s1397_s30 = scalar_lea.hbm %s1452_s6, %s981_s14  ;;  %s1399_s20 = int_to_ptr.vmem [resolvable:$true] %s859_s20 }
  0x1c   : > { %1002 = vmatpush3.bf16.msra.mxu0 %v1089_v5  ;;  %1008 = vmatpush3.bf16.msra.mxu1 %v1093_v9  ;;  %s845_s24 = scalar_lea.sflag [#allocation3], %s287_s18  ;;  %s1140_s8 = scalar_lea.vmem %s1399_s20, 64 }
  0x1d   : > { %1013 = vmatprep.subr.bf16.mxu0 %v1092_v8  ;;  %1019 = vmatprep.subr.bf16.mxu1 %v1095_v11  ;;  %p1141_p12 = scmp.ne.s32.totalorder %s1399_s20, %s1140_s8  ;;  %s1146_s13 = scalar_lea.vmem %s1145_s12, 128 }
  0x1e   : > { %705 = vperm.xlu0 %1087, %v691_v15   ;;  %710 = vperm.xlu1 %1088, %v692_v16   ;;  %p1147_p1 = scmp.lt.s32.totalorder %s1399_s20, %s1145_s12  ;;  %p1148_p2 = scmp.lt.s32.totalorder %s1146_s13, %s1140_s8 }
  0x1f   : > { %1004 = vmatmul.mubr.msk.bf16.vlgmr.msra.gmra.mrb[0].mxu0 %vm335_vm0, %v1091_v6  ;;  %1010 = vmatmul.mubr.msk.bf16.vlgmr.msra.gmra.mrb[0].mxu1 %vm335_vm0, %v1091_v6  ;;  %p1142_p13 = pnand %p1141_p12, %p1297_p4 }
  0x20   : > { %1014 = vmatpush3.bf16.msra.mxu0 %v1092_v8  ;;  %1015 = vmatprep.mubr.msk.bf16.mxu0 %vm335_vm0, %v1090_v0  ;;  %p1149_p3 = por %p1148_p2, %p1147_p1 }
  0x21   : > { %1025 = vmatprep.subr.bf16.mxu0 %v1094_v10  ;;  %1020 = vmatpush3.bf16.msra.mxu1 %v1095_v11  ;;  %p1143_p0 = pneg %p1142_p13 }
  0x22   : > { %1021 = vmatprep.mubr.msk.bf16.mxu1 %vm335_vm0, %v1090_v0 }
  0x23   : > { %p1150_p5 = pnand %p1149_p3, %p1143_p0 }
  0x27   : > { %1016 = vmatmul.mubr.msk.bf16.vlgmr.msra.gmra.mrb[4].mxu0 %vm335_vm0, %v1091_v6  ;;  %1022 = vmatmul.mubr.msk.bf16.vlgmr.msra.gmra.mrb[4].mxu1 %vm335_vm0, %v1091_v6 }
  0x28   : > { %1026 = vmatpush3.bf16.msra.mxu0 %v1094_v10  ;;  %1027 = vmatprep.mubr.msk.bf16.mxu0 %vm335_vm0, %v1096_v14 }
  0x2f   : > { %1028 = vmatmul.mubr.msk.bf16.vlgmr.msra.gmra.mrb[8].mxu0 %vm335_vm0, %v1097_v17 }
  0x90   : > { %v569_v34 = vpop.permute.xlu0 %568  ;;  %v579_v35 = vpop.permute.xlu1 %578 }
  0x94   : > { %v574_v46 = vpop.permute.xlu0 %573  ;;  %v584_v47 = vpop.permute.xlu1 %583 }
  0x98   : > { %v696_v1 = vpop.permute.xlu0 %695  ;;  %v701_v8 = vpop.permute.xlu1 %700 }
  0x9d   : > { %v706_v9 = vpop.permute.xlu0 %705 }
  0xf2   : > { %v1005_v18 = vpop.f32.mrb[0].mxu0  ;;  %v1011_v21 = vpop.f32.mrb[0].mxu1 }
  0xf3   : > { %v376_v19 = vpop.f32.mrb[1].mxu0  ;;  %v431_v23 = vpop.f32.mrb[1].mxu1 }
  0xf4   : > { %v1006_v20 = vpop.f32.mrb[2].mxu0  ;;  %v1012_v24 = vpop.f32.mrb[2].mxu1 }
  0xf5   : > { %v379_v22 = vpop.f32.mrb[3].mxu0  ;;  %v434_v25 = vpop.f32.mrb[3].mxu1 }
  0xfa   : > { %v1017_v26 = vpop.f32.mrb[4].mxu0  ;;  %v1023_v29 = vpop.f32.mrb[4].mxu1 }
  0xfb   : > { %v486_v27 = vpop.f32.mrb[5].mxu0  ;;  %v541_v31 = vpop.f32.mrb[5].mxu1 }
  0xfc   : > { %v1018_v28 = vpop.f32.mrb[6].mxu0  ;;  %v1024_v32 = vpop.f32.mrb[6].mxu1 }
  0xfd   : > { %v489_v30 = vpop.f32.mrb[7].mxu0  ;;  %v544_v33 = vpop.f32.mrb[7].mxu1 }
 0x102   : > { %v1029_v36 = vpop.f32.mrb[8].mxu0 }
 0x103   : > { %v651_v37 = vadd.f32 %v1029_v36, %v579_v35  ;;  %v642_v38 = vpop.f32.mrb[9].mxu0 }
 0x104   : > { %v643_v39 = vadd.f32 %v642_v38, %v569_v34  ;;  %v1030_v40 = vpop.f32.mrb[10].mxu0 }
 0x105   : > { %v659_v41 = vadd.f32 %v1005_v18, %v651_v37  ;;  %v663_v42 = vadd.f32 %v1011_v21, %v651_v37  ;;  %v667_v43 = vadd.f32 %v1017_v26, %v651_v37  ;;  %v671_v44 = vadd.f32 %v1023_v29, %v651_v37  ;;  %v645_v45 = vpop.f32.mrb[11].mxu0  ;;  %v711_v26 = vpop.permute.xlu1 %710 }
 0x106   : > { %v657_v48 = vadd.f32 %v643_v39, %v376_v19  ;;  %v661_v49 = vadd.f32 %v643_v39, %v431_v23  ;;  %v665_v50 = vadd.f32 %v643_v39, %v486_v27  ;;  %v669_v51 = vadd.f32 %v643_v39, %v541_v31 }
 0x107   : > { %1098 = vtanh.f32 %v659_v41  ;;  %v654_v52 = vadd.f32 %v1030_v40, %v584_v47  ;;  %v646_v53 = vadd.f32 %v645_v45, %v574_v46 }
 0x108   : > { %1100 = vtanh.f32 %v663_v42 }
 0x109   : > { %1102 = vtanh.f32 %v667_v43  ;;  %v660_v54 = vadd.f32 %v1006_v20, %v654_v52  ;;  %v664_v55 = vadd.f32 %v1012_v24, %v654_v52  ;;  %v668_v56 = vadd.f32 %v1018_v28, %v654_v52 }
 0x10a   : > { %1104 = vtanh.f32 %v671_v44  ;;  %v672_v57 = vadd.f32 %v1024_v32, %v654_v52  ;;  %v658_v58 = vadd.f32 %v646_v53, %v379_v22  ;;  %v662_v59 = vadd.f32 %v646_v53, %v434_v25 }
 0x10b   : > { %1106 = vtanh.f32 %v657_v48  ;;  %v666_v60 = vadd.f32 %v646_v53, %v489_v30  ;;  %v670_v61 = vadd.f32 %v646_v53, %v544_v33 }
 0x10c   : > { %1108 = vtanh.f32 %v661_v49 }
 0x10d   : > { %1110 = vtanh.f32 %v665_v50 }
 0x10e   : > { %1112 = vtanh.f32 %v669_v51 }
 0x10f   : > { %1114 = vtanh.f32 %v660_v54 }
 0x110   : > { %1116 = vtanh.f32 %v664_v55 }
 0x111   : > { %v1099_v62 = vpop.eup %1098  ;;  %1118 = vtanh.f32 %v668_v56 }
 0x112   : > { %v1101_v63 = vpop.eup %1100  ;;  %1120 = vtanh.f32 %v672_v57  ;;  %v715_v11 = vmul.f32 %v1099_v62, %v706_v9 }
 0x113   : > { %v1103_v0 = vpop.eup %1102  ;;  %1122 = vtanh.f32 %v658_v58  ;;  %v719_v15 = vmul.f32 %v1101_v63, %v706_v9 }
 0x114   : > { %v1105_v2 = vpop.eup %1104  ;;  %1124 = vtanh.f32 %v662_v59  ;;  %v723_v19 = vmul.f32 %v1103_v0, %v706_v9  ;;  %v733_v24 = vsel %vm729_vm1, %v715_v11, 0.0 }
 0x115   : > { %v1107_v3 = vpop.eup %1106  ;;  %1126 = vtanh.f32 %v666_v60  ;;  %v727_v23 = vmul.f32 %v1105_v2, %v706_v9  ;;  %v746_v30 = vsel %vm729_vm1, %v719_v15, 0.0 }
 0x116   : > { %v1109_v4 = vpop.eup %1108  ;;  %1128 = vtanh.f32 %v670_v61  ;;  %v713_v13 = vmul.f32 %v1107_v3, %v696_v1  ;;  %v759_v50 = vsel %vm729_vm1, %v723_v19, 0.0 }
 0x117   : > { %v1111_v5 = vpop.eup %1110  ;;  %v717_v14 = vmul.f32 %v1109_v4, %v696_v1  ;;  %v772_v55 = vsel %vm729_vm1, %v727_v23, 0.0 }
 0x118   : > { %v1113_v6 = vpop.eup %1112  ;;  %v721_v17 = vmul.f32 %v1111_v5, %v696_v1  ;;  %v730_v28 = vsel %vm729_vm1, %v713_v13, 0.0 }
 0x119   : > { %v1115_v7 = vpop.eup %1114  ;;  %v725_v22 = vmul.f32 %v1113_v6, %v696_v1  ;;  %v743_v29 = vsel %vm729_vm1, %v717_v14, 0.0 }
 0x11a   : > { %v1117_v10 = vpop.eup %1116  ;;  %v716_v32 = vmul.f32 %v1115_v7, %v711_v26  ;;  %v756_v35 = vsel %vm729_vm1, %v721_v17, 0.0 }
 0x11b   : > { %v1119_v12 = vpop.eup %1118  ;;  %v720_v36 = vmul.f32 %v1117_v10, %v711_v26  ;;  %v769_v43 = vsel %vm729_vm1, %v725_v22, 0.0 }
 0x11c   : > { %v1121_v16 = vpop.eup %1120  ;;  %v724_v40 = vmul.f32 %v1119_v12, %v711_v26  ;;  %v735_v48 = vsel %vm729_vm1, %v716_v32, 0.0 }
 0x11d   : > { %v1123_v18 = vpop.eup %1122  ;;  %v728_v44 = vmul.f32 %v1121_v16, %v711_v26  ;;  %v748_v53 = vsel %vm729_vm1, %v720_v36, 0.0 }
 0x11e   : > { %v1125_v20 = vpop.eup %1124  ;;  %v714_v21 = vmul.f32 %v1123_v18, %v701_v8  ;;  %v761_v57 = vsel %vm729_vm1, %v724_v40, 0.0 }
 0x11f   : > { %v1127_v25 = vpop.eup %1126  ;;  %v718_v27 = vmul.f32 %v1125_v20, %v701_v8  ;;  %v774_v61 = vsel %vm729_vm1, %v728_v44, 0.0 }
 0x120   : > { %v1129_v31 = vpop.eup %1128  ;;  %v722_v33 = vmul.f32 %v1127_v25, %v701_v8  ;;  %v731_v34 = vsel %vm729_vm1, %v714_v21, 0.0 }
 0x121   : > { %v726_v37 = vmul.f32 %v1129_v31, %v701_v8  ;;  %v732_v38 = vadd.f32 %v731_v34, %v730_v28  ;;  %v744_v39 = vsel %vm729_vm1, %v718_v27, 0.0 }
 0x122   : > { %v745_v41 = vadd.f32 %v744_v39, %v743_v29  ;;  %v757_v42 = vsel %vm729_vm1, %v722_v33, 0.0 }
 0x123   : > { %v734_v45 = vadd.f32 %v733_v24, %v732_v38  ;;  %v758_v46 = vadd.f32 %v757_v42, %v756_v35  ;;  %v770_v47 = vsel %vm729_vm1, %v726_v37, 0.0 }
 0x124   : > { %v747_v49 = vadd.f32 %v746_v30, %v745_v41  ;;  %v771_v51 = vadd.f32 %v770_v47, %v769_v43 }
 0x125   : > { %v736_v52 = vadd.f32 %v735_v48, %v734_v45  ;;  %v760_v54 = vadd.f32 %v759_v50, %v758_v46 }
 0x126   : > { %v749_v56 = vadd.f32 %v748_v53, %v747_v49  ;;  %v773_v58 = vadd.f32 %v772_v55, %v771_v51 }
 0x127   : > { %v737_v59 = vrot.slane %v736_v52, 4  ;;  %v762_v60 = vadd.f32 %v761_v57, %v760_v54  ;;  %v824_v54 = vlaneseq }
 0x128   : > { %v750_v62 = vrot.slane %v749_v56, 4  ;;  %v775_v63 = vadd.f32 %v774_v61, %v773_v58 }
 0x129   : > { %v738_v0 = vadd.f32 %v737_v59, %v736_v52  ;;  %v763_v1 = vrot.slane %v762_v60, 4  ;;  %v825_v55 = vshrl.u32 %v824_v54, 7 }
 0x12a   : > { %v751_v2 = vadd.f32 %v750_v62, %v749_v56  ;;  %v776_v3 = vrot.slane %v775_v63, 4 }
 0x12b   : > { %v739_v4 = vrot.slane %v738_v0, 2  ;;  %v764_v5 = vadd.f32 %v763_v1, %v762_v60  ;;  %v826_v56 = vsub.s32 0, %v825_v55 }
 0x12c   : > { %v752_v6 = vrot.slane %v751_v2, 2  ;;  %v777_v7 = vadd.f32 %v776_v3, %v775_v63 }
 0x12d   : > { %v740_v8 = vadd.f32 %v739_v4, %v738_v0  ;;  %v765_v9 = vrot.slane %v764_v5, 2 }
 0x12e   : > { %v753_v10 = vadd.f32 %v752_v6, %v751_v2  ;;  %v778_v11 = vrot.slane %v777_v7, 2 }
 0x12f   : > { %v741_v12 = vrot.slane %v740_v8, 1  ;;  %v766_v13 = vadd.f32 %v765_v9, %v764_v5 }
 0x130   : > { %v754_v14 = vrot.slane %v753_v10, 1  ;;  %v779_v15 = vadd.f32 %v778_v11, %v777_v7 }
 0x131   : > { %v742_v16 = vadd.f32 %v741_v12, %v740_v8  ;;  %v767_v17 = vrot.slane %v766_v13, 1 }
 0x132   : > { %v755_v18 = vadd.f32 %v754_v14, %v753_v10  ;;  %v780_v19 = vrot.slane %v779_v15, 1 }
 0x133   : > { %v768_v20 = vadd.f32 %v767_v17, %v766_v13  ;;  %v782_v21 = vsel %vm729_vm1, %v742_v16, -inf }
 0x134   : > { %v781_v22 = vadd.f32 %v780_v19, %v779_v15  ;;  %v783_v23 = vsel %vm729_vm1, %v755_v18, -inf }
 0x135   : > { %v784_v24 = vsel %vm729_vm1, %v768_v20, -inf  ;;  %v786_v25 = vmax.f32 %v782_v21, %v783_v23 }
 0x136   : > { %v785_v26 = vsel %vm729_vm1, %v781_v22, -inf }
 0x137   : > { %v787_v27 = vmax.f32 %v784_v24, %v785_v26 }
 0x139   : > { %v788_v28 = vmax.f32 %v786_v25, %v787_v27 }
 0x13b   : > { %v789_v29 = vsub.f32 %v742_v16, %v788_v28  ;;  %v790_v30 = vsub.f32 %v755_v18, %v788_v28  ;;  %v791_v31 = vsub.f32 %v768_v20, %v788_v28  ;;  %v792_v32 = vsub.f32 %v781_v22, %v788_v28 }
 0x13d   : > { %v793_v33 = vmul.f32 1.442695, %v789_v29  ;;  %v795_v34 = vmul.f32 1.442695, %v790_v30  ;;  %v797_v35 = vmul.f32 1.442695, %v791_v31 }
 0x13e   : > { %v799_v36 = vmul.f32 1.442695, %v792_v32 }
 0x13f   : > { %1130 = vpow2.f32 %v793_v33 }
 0x140   : > { %1132 = vpow2.f32 %v795_v34 }
 0x141   : > { %1134 = vpow2.f32 %v797_v35 }
 0x142   : > { %1136 = vpow2.f32 %v799_v36 }
 0x149   : > { %v1131_v37 = vpop.eup %1130 }
 0x14a   : > { %v1133_v38 = vpop.eup %1132 }
 0x14b   : > { %v1135_v39 = vpop.eup %1134  ;;  %v805_v40 = vrot.slane %v1133_v38, 7 }
 0x14c   : > { %v1137_v41 = vpop.eup %1136  ;;  %v808_v42 = vrot.slane %v1135_v39, 6 }
 0x14d   : > { %v807_v43 = vsel %vm806_vm2, %v805_v40, %v1131_v37  ;;  %v811_v44 = vrot.slane %v1137_v41, 5 }
 0x14e   : > { %v810_v45 = vsel %vm809_vm3, %v808_v42, %v807_v43 }
 0x14f   : > { %v813_v46 = vsel %vm812_vm4, %v811_v44, %v810_v45 }
 0x150   : > { %v816_v47 = vsel %vm815_vm5, %v813_v46, 0.0 }
 0x151   : > { %v817_v48 = vrot.slane %v816_v47, 4 }
 0x153   : > { %v818_v49 = vadd.f32 %v817_v48, %v816_v47 }
 0x155   : > { %v819_v50 = vrot.slane %v818_v49, 2 }
 0x157   : > { %v820_v51 = vadd.f32 %v819_v50, %v818_v49 }
 0x159   : > { %v821_v52 = vrot.slane %v820_v51, 1 }
 0x15b   : > { %v822_v53 = vadd.f32 %v821_v52, %v820_v51 }
 0x15d   : > { %1138 = vrcp.f32 %v822_v53 }
 0x167   : > { %v1139_v57 = vpop.eup %1138 }
 0x168   : > { %v827_v58 = vrot.slane %v1139_v57, %v826_v56 }
 0x16a   : > { %v828_v59 = vmul.f32 %v1131_v37, %v827_v58  ;;  %v829_v60 = vmul.f32 %v1133_v38, %v827_v58  ;;  %v830_v61 = vmul.f32 %v1135_v39, %v827_v58  ;;  %v831_v62 = vmul.f32 %v1137_v41, %v827_v58 }
 0x16c   : > { %v836_v63 = vrot.slane %v829_v60, 7  ;;  %v838_v0 = vrot.slane %v830_v61, 6  ;;  %v840_v2 = vrot.slane %v831_v62, 5 }
 0x16e   : > { %v837_v1 = vsel %vm806_vm2, %v836_v63, %v828_v59 }
 0x16f   : > { %v839_v3 = vsel %vm809_vm3, %v838_v0, %v837_v1 }
 0x170   : > { %v841_v4 = vsel %vm812_vm4, %v840_v2, %v839_v3 }
 0x171   : > { %843 = vst.msk [vmem:[%s289_s15] sm:$0xf] %vm815_vm5, %v841_v4 }
 0x172   : > { %1153 = shalt.err (!%p1150_p5)
}
 0x173   : > { %s1154_s16 = scalar_lea.hbm %s1397_s30, 64  ;;  %s1158_s19 = scalar_lea.hbm %s1452_s6, 128 }
 0x174   : > { %p1155_p6 = scmp.ne.s32.totalorder %s1397_s30, %s1154_s16  ;;  %p1159_p10 = scmp.lt.u32.totalorder %s1397_s30, %s1452_s6 }
 0x175   : > { %p1160_p11 = scmp.lt.u32.totalorder %s1158_s19, %s1154_s16  ;;  %p1162_p13 = scmp.lt.u32.totalorder %s1154_s16, %s1397_s30 }
 0x176   : > { %p1156_p7 = pnand %p1155_p6, %p1297_p4 }
 0x177   : > { %p1161_p12 = por %p1160_p11, %p1159_p10 }
 0x178   : > { %p1157_p9 = pneg %p1156_p7 }
 0x179   : > { %p1163_p0 = por %p1162_p13, %p1161_p12 }
 0x17b   : > { %p1164_p1 = pnand %p1163_p0, %p1157_p9 }
 0x17d   : > { %1167 = shalt.err (!%p1164_p1)
}
 0x17e   : > { %1031 = dma.vmem_to_hbm [thread:$0]  (%p1297_p4), %s1399_s20, 64, %s1397_s30, %s845_s24  }
 0x17f PF: > { %p1037_p2 = scmp.ge.s32.totalorder %s1218_s26, 2  ;;  %s871_s27 = sand.u32 1, %s1198_s21  }
 0x180   : > { %s872_s28 = scalar_lea.sflag [#allocation3], %s871_s27 }
 0x181   : > { %p1034_p3 = pnand %p1037_p2, %p1304_p8 }
 0x183   : > { %1193 = dma.done.wait (!%p1034_p3), %s872_s28, 64  }
 0x184   : > { %1195 = vsyncadd (!%p1034_p3), %s872_s28, 4294967232  ;;  %s19_s26 = sadd.s32 1, %s1218_s26   ;;  %s1455_s21 = smov %s1202_s22 }
 0x185   : > { %p16_p5 = scmp.ge.s32.totalorder %s19_s26, 4   ;;  %s1456_s22 = smov %s1206_s23 }
 0x186   : > { %s1457_s23 = smov %s1310_s10  ;;  %s1458_s24 = smov %s1214_s25 }
 0x187   : > { %s1459_s25 = smov %s1461_s29  ;;  %18 = sbr.rel (!%p16_p5) target bundleno = 4 (0x4), region = 82 }
 0x18e   :  { %877 = vsyncpa [#allocation3], 1 }
 0x18f   :  { %879 = vsyncpa [#allocation3 + $0x1], 1 }

</bundles_post_ra>
